<compile_context>
chip_gen: v7x
topology: tpu7x:2x2x1
jax: 0.10.0
libtpu: 0.0.40
codegen_flags: <defaults>
</compile_context>

<pallas_src>
import jax
import jax.numpy as jnp
from jax.experimental import pallas as pl
from jax.experimental.pallas import tpu as pltpu


def mlp_kernel(x_ref,
               w1_ref, b1_ref,
               w2_ref, b2_ref,
               w3_ref, b3_ref,
               w4_ref, b4_ref,
               o_ref):
    x = x_ref[...]                                                 # (1, TB)

    # Layer 1: in_features == 1 -> outer product on the VPU (skip the MXU).
    h1 = jnp.maximum(w1_ref[...] * x + b1_ref[...], 0.0)          # (64, TB)

    # Layer 2: (32,64) @ (64,TB) -> lane-dense N = TB.
    h2 = jnp.dot(w2_ref[...], h1, preferred_element_type=jnp.float32) + b2_ref[...]
    h2 = jnp.maximum(h2, 0.0)                                      # (32, TB)

    # Layer 3: (16,32) @ (32,TB).
    h3 = jnp.dot(w3_ref[...], h2, preferred_element_type=jnp.float32) + b3_ref[...]
    h3 = jnp.maximum(h3, 0.0)                                      # (16, TB)

    # Output layer: (1,16) @ (16,TB) -> output last dim TB, unmasked stores.
    out = jnp.dot(w4_ref[...], h3, preferred_element_type=jnp.float32) + b4_ref[...]
    o_ref[...] = out.astype(o_ref.dtype)                           # (1, TB)


def _round_up(x, m):
    return (x + m - 1) // m * m


@jax.jit
def nn_forward(x, params):
    """Forward pass matching PyTorch NN.forward (y = x @ W.T + b with ReLU)."""
    (w1, b1), (w2, b2), (w3, b3), (w4, b4) = params
    B = x.shape[0]

    # Batch tile on the lane axis: multiple of 128; cap at 2048 (per-column
    # activation footprint ~114 f32, so TB=2048 is < 1 MiB of live activations).
    TB = min(2048, _round_up(max(B, 1), 128))
    B_pad = _round_up(B, TB)
    grid = (B_pad // TB,)

    # Feature-major args: x (B,1) -> (1,B_pad); weights kept as PyTorch (out,in);
    # biases become (out,1) columns.
    x_fm = jnp.zeros((1, B_pad), jnp.float32).at[0, :B].set(x[:, 0])
    args = (
        x_fm,
        w1, b1.reshape(-1, 1),
        w2, b2.reshape(-1, 1),
        w3, b3.reshape(-1, 1),
        w4, b4.reshape(-1, 1),
    )

    # Weights/biases: full-array blocks, constant index_map -> VMEM-resident
    # (no re-DMA across grid steps).
    resident = lambda a: pl.BlockSpec(a.shape, lambda i: (0, 0))

    n_w = 64 + 64 * 32 + 32 * 16 + 16
    n_b = 64 + 32 + 16 + 1
    cost = pl.CostEstimate(
        flops=2 * B_pad * n_w + B_pad * n_b,
        transcendentals=0,
        bytes_accessed=4 * (2 * B_pad + n_w + n_b),
    )

    out_fm = pl.pallas_call(
        mlp_kernel,
        out_shape=jax.ShapeDtypeStruct((1, B_pad), jnp.float32),
        grid=grid,
        in_specs=[pl.BlockSpec((1, TB), lambda i: (0, i))]
                 + [resident(a) for a in args[1:]],
        out_specs=pl.BlockSpec((1, TB), lambda i: (0, i)),
        compiler_params=pltpu.CompilerParams(
            dimension_semantics=("parallel",)),
        cost_estimate=cost,
    )(*args)

    return out_fm[0, :B].reshape(B, 1)


def init_params(key):
    """Deterministic init mimicking PyTorch Linear default (uniform +-1/sqrt(fan_in)).
    Weights stored in PyTorch (out_features, in_features) layout."""
    sizes = [(1, 64), (64, 32), (32, 16), (16, 1)]
    params = []
    for (fan_in, fan_out) in sizes:
        key, kw, kb = jax.random.split(key, 3)
        bound = 1.0 / jnp.sqrt(fan_in)
        w = jax.random.uniform(kw, (fan_out, fan_in), jnp.float32, -bound, bound)
        b = jax.random.uniform(kb, (fan_out,), jnp.float32, -bound, bound)
        params.append((w, b))
    return params


def reference_forward(x, params):
    h = x
    for i, (w, b) in enumerate(params):
        h = h @ w.T + b
        if i < len(params) - 1:
            h = jnp.maximum(h, 0.0)
    return h


# TODO(synk): training pieces of the original module (Adam optimizer, MSELoss)
# are not part of the forward pass and are not implemented here.

if __name__ == "__main__":
    key = jax.random.PRNGKey(0)
    kx, kp, kx2 = jax.random.split(key, 3)

    params = init_params(kp)

    # Small shape consistent with the module (Linear(1, ...)): batch=8, features=1.
    B = 8
    x = jax.random.normal(kx, (B, 1), jnp.float32)
    out = jax.block_until_ready(nn_forward(x, params))
    ref = reference_forward(x, params)
    assert out.shape == (B, 1), out.shape
    assert jnp.allclose(out, ref, atol=1e-5, rtol=1e-5), (out, ref)

    # Exercise the padded / multi-step grid path (TB=2048, grid=2).
    B2 = 2500
    x2 = jax.random.normal(kx2, (B2, 1), jnp.float32)
    out2 = jax.block_until_ready(nn_forward(x2, params))
    ref2 = reference_forward(x2, params)
    assert out2.shape == (B2, 1), out2.shape
    assert jnp.allclose(out2, ref2, atol=1e-5, rtol=1e-5)

    print("KERNEL_OK")
</pallas_src>

<mosaic_0001>
module attributes {stable_mosaic.version = 11 : i64} {
  func.func @mlp_kernel(%arg0: i32, %arg1: memref<1x128xf32, #tpu.memory_space<vmem>>, %arg2: memref<64x1xf32, #tpu.memory_space<vmem>>, %arg3: memref<64x1xf32, #tpu.memory_space<vmem>>, %arg4: memref<32x64xf32, #tpu.memory_space<vmem>>, %arg5: memref<32x1xf32, #tpu.memory_space<vmem>>, %arg6: memref<16x32xf32, #tpu.memory_space<vmem>>, %arg7: memref<16x1xf32, #tpu.memory_space<vmem>>, %arg8: memref<1x16xf32, #tpu.memory_space<vmem>>, %arg9: memref<1x1xf32, #tpu.memory_space<vmem>>, %arg10: memref<1x128xf32, #tpu.memory_space<vmem>>) attributes {dimension_semantics = [#tpu.dimension_semantics<parallel>], iteration_bounds = array<i64: 1>, scalar_prefetch = 0 : i64, scratch_operands = 0 : i64, tpu.core_type = #tpu.core_type<tc>, window_params = [{transform_indices = @transform_0, window_bounds = array<i64: 1, 128>}, {pipeline_mode = #tpu.pipeline_mode<synchronous>, transform_indices = @transform_1, window_bounds = array<i64: 64, 1>}, {pipeline_mode = #tpu.pipeline_mode<synchronous>, transform_indices = @transform_2, window_bounds = array<i64: 64, 1>}, {pipeline_mode = #tpu.pipeline_mode<synchronous>, transform_indices = @transform_3, window_bounds = array<i64: 32, 64>}, {pipeline_mode = #tpu.pipeline_mode<synchronous>, transform_indices = @transform_4, window_bounds = array<i64: 32, 1>}, {pipeline_mode = #tpu.pipeline_mode<synchronous>, transform_indices = @transform_5, window_bounds = array<i64: 16, 32>}, {pipeline_mode = #tpu.pipeline_mode<synchronous>, transform_indices = @transform_6, window_bounds = array<i64: 16, 1>}, {pipeline_mode = #tpu.pipeline_mode<synchronous>, transform_indices = @transform_7, window_bounds = array<i64: 1, 16>}, {pipeline_mode = #tpu.pipeline_mode<synchronous>, transform_indices = @transform_8, window_bounds = array<i64: 1, 1>}, {transform_indices = @transform_9, window_bounds = array<i64: 1, 128>}]} {
    %c0 = arith.constant 0 : index
    %c0_0 = arith.constant 0 : index
    %0 = vector.load %arg1[%c0, %c0_0] : memref<1x128xf32, #tpu.memory_space<vmem>>, vector<1x128xf32>
    %c0_1 = arith.constant 0 : index
    %c0_2 = arith.constant 0 : index
    %1 = vector.load %arg2[%c0_1, %c0_2] : memref<64x1xf32, #tpu.memory_space<vmem>>, vector<64x1xf32>
    %2 = vector.broadcast %1 : vector<64x1xf32> to vector<64x128xf32>
    %3 = vector.broadcast %0 : vector<1x128xf32> to vector<64x128xf32>
    %4 = arith.mulf %2, %3 : vector<64x128xf32>
    %c0_3 = arith.constant 0 : index
    %c0_4 = arith.constant 0 : index
    %5 = vector.load %arg3[%c0_3, %c0_4] : memref<64x1xf32, #tpu.memory_space<vmem>>, vector<64x1xf32>
    %6 = vector.broadcast %5 : vector<64x1xf32> to vector<64x128xf32>
    %7 = arith.addf %4, %6 : vector<64x128xf32>
    %cst = arith.constant 0.000000e+00 : f32
    %8 = vector.broadcast %cst : f32 to vector<64x128xf32>
    %9 = arith.maximumf %7, %8 : vector<64x128xf32>
    %c0_5 = arith.constant 0 : index
    %c0_6 = arith.constant 0 : index
    %10 = vector.load %arg4[%c0_5, %c0_6] : memref<32x64xf32, #tpu.memory_space<vmem>>, vector<32x64xf32>
    %cst_7 = arith.constant dense<0.000000e+00> : vector<32x128xf32>
    %11 = tpu.matmul %10, %9, %cst_7 {dimension_numbers = #tpu.dot_dimension_numbers<[1], [0], [0], [1], [0, 0, 1, 1], [], []>} : vector<32x64xf32>, vector<64x128xf32>, vector<32x128xf32> -> vector<32x128xf32>
    %c0_8 = arith.constant 0 : index
    %c0_9 = arith.constant 0 : index
    %12 = vector.load %arg5[%c0_8, %c0_9] : memref<32x1xf32, #tpu.memory_space<vmem>>, vector<32x1xf32>
    %13 = vector.broadcast %12 : vector<32x1xf32> to vector<32x128xf32>
    %14 = arith.addf %11, %13 : vector<32x128xf32>
    %cst_10 = arith.constant 0.000000e+00 : f32
    %15 = vector.broadcast %cst_10 : f32 to vector<32x128xf32>
    %16 = arith.maximumf %14, %15 : vector<32x128xf32>
    %c0_11 = arith.constant 0 : index
    %c0_12 = arith.constant 0 : index
    %17 = vector.load %arg6[%c0_11, %c0_12] : memref<16x32xf32, #tpu.memory_space<vmem>>, vector<16x32xf32>
    %cst_13 = arith.constant dense<0.000000e+00> : vector<16x128xf32>
    %18 = tpu.matmul %17, %16, %cst_13 {dimension_numbers = #tpu.dot_dimension_numbers<[1], [0], [0], [1], [0, 0, 1, 1], [], []>} : vector<16x32xf32>, vector<32x128xf32>, vector<16x128xf32> -> vector<16x128xf32>
    %c0_14 = arith.constant 0 : index
    %c0_15 = arith.constant 0 : index
    %19 = vector.load %arg7[%c0_14, %c0_15] : memref<16x1xf32, #tpu.memory_space<vmem>>, vector<16x1xf32>
    %20 = vector.broadcast %19 : vector<16x1xf32> to vector<16x128xf32>
    %21 = arith.addf %18, %20 : vector<16x128xf32>
    %cst_16 = arith.constant 0.000000e+00 : f32
    %22 = vector.broadcast %cst_16 : f32 to vector<16x128xf32>
    %23 = arith.maximumf %21, %22 : vector<16x128xf32>
    %c0_17 = arith.constant 0 : index
    %c0_18 = arith.constant 0 : index
    %24 = vector.load %arg8[%c0_17, %c0_18] : memref<1x16xf32, #tpu.memory_space<vmem>>, vector<1x16xf32>
    %cst_19 = arith.constant dense<0.000000e+00> : vector<1x128xf32>
    %25 = tpu.matmul %24, %23, %cst_19 {dimension_numbers = #tpu.dot_dimension_numbers<[1], [0], [0], [1], [0, 0, 1, 1], [], []>} : vector<1x16xf32>, vector<16x128xf32>, vector<1x128xf32> -> vector<1x128xf32>
    %c0_20 = arith.constant 0 : index
    %c0_21 = arith.constant 0 : index
    %26 = vector.load %arg9[%c0_20, %c0_21] : memref<1x1xf32, #tpu.memory_space<vmem>>, vector<1x1xf32>
    %27 = vector.broadcast %26 : vector<1x1xf32> to vector<1x128xf32>
    %28 = arith.addf %25, %27 : vector<1x128xf32>
    %c0_22 = arith.constant 0 : index
    %c0_23 = arith.constant 0 : index
    %29 = vector.load %arg10[%c0_22, %c0_23] : memref<1x128xf32, #tpu.memory_space<vmem>>, vector<1x128xf32>
    tpu.vector_store %arg10[%c0_22, %c0_23], %28 {strides = array<i32>} : memref<1x128xf32, #tpu.memory_space<vmem>>, vector<1x128xf32>,
    return
  }
  func.func @transform_0(%arg0: i32) -> (i32, i32) {
    %c0_i32 = arith.constant 0 : i32
    %c0_i32_0 = arith.constant 0 : i32
    return %c0_i32, %arg0 : i32, i32
  }
  func.func @transform_1(%arg0: i32) -> (i32, i32) {
    %c0_i32 = arith.constant 0 : i32
    %c0_i32_0 = arith.constant 0 : i32
    %c0_i32_1 = arith.constant 0 : i32
    return %c0_i32, %c0_i32_0 : i32, i32
  }
  func.func @transform_2(%arg0: i32) -> (i32, i32) {
    %c0_i32 = arith.constant 0 : i32
    %c0_i32_0 = arith.constant 0 : i32
    %c0_i32_1 = arith.constant 0 : i32
    return %c0_i32, %c0_i32_0 : i32, i32
  }
  func.func @transform_3(%arg0: i32) -> (i32, i32) {
    %c0_i32 = arith.constant 0 : i32
    %c0_i32_0 = arith.constant 0 : i32
    %c0_i32_1 = arith.constant 0 : i32
    return %c0_i32, %c0_i32_0 : i32, i32
  }
  func.func @transform_4(%arg0: i32) -> (i32, i32) {
    %c0_i32 = arith.constant 0 : i32
    %c0_i32_0 = arith.constant 0 : i32
    %c0_i32_1 = arith.constant 0 : i32
    return %c0_i32, %c0_i32_0 : i32, i32
  }
  func.func @transform_5(%arg0: i32) -> (i32, i32) {
    %c0_i32 = arith.constant 0 : i32
    %c0_i32_0 = arith.constant 0 : i32
    %c0_i32_1 = arith.constant 0 : i32
    return %c0_i32, %c0_i32_0 : i32, i32
  }
  func.func @transform_6(%arg0: i32) -> (i32, i32) {
    %c0_i32 = arith.constant 0 : i32
    %c0_i32_0 = arith.constant 0 : i32
    %c0_i32_1 = arith.constant 0 : i32
    return %c0_i32, %c0_i32_0 : i32, i32
  }
  func.func @transform_7(%arg0: i32) -> (i32, i32) {
    %c0_i32 = arith.constant 0 : i32
    %c0_i32_0 = arith.constant 0 : i32
    %c0_i32_1 = arith.constant 0 : i32
    return %c0_i32, %c0_i32_0 : i32, i32
  }
  func.func @transform_8(%arg0: i32) -> (i32, i32) {
    %c0_i32 = arith.constant 0 : i32
    %c0_i32_0 = arith.constant 0 : i32
    %c0_i32_1 = arith.constant 0 : i32
    return %c0_i32, %c0_i32_0 : i32, i32
  }
  func.func @transform_9(%arg0: i32) -> (i32, i32) {
    %c0_i32 = arith.constant 0 : i32
    %c0_i32_0 = arith.constant 0 : i32
    return %c0_i32, %arg0 : i32, i32
  }
}

</mosaic_0001>

<bundles_post_ra>
// kernel: nn_forward.1
= control target key start
LH: loop header
LB: loop body
LE: loop exit
PB: predicated region body
PF: predicated region fallthrough
CT: control target
= control target key end

     0   :  { %v581_v0 = vmov 0   ;;  %vm189_vm0 = vcmask 523264   ;;  %vm305_vm1 = vcmask 261120   ;;  %vm583_vm2 = vmmov 0   ;;  %s737_s2 = inlined_call_operand.vmem [shape: f32[64,1], index: 2, kind: input, shape index: {}]   ;;  %s738_s1 = inlined_call_operand.vmem [shape: f32[64,1], index: 1, kind: input, shape index: {}]   ;;  %s739_s8 = inlined_call_operand.<no memory space> [shape: f32[1,1], index: 8, kind: input, shape index: {}]   ;;  %s740_s4 = inlined_call_operand.vmem [shape: f32[32,1], index: 4, kind: input, shape index: {}]   ;;  %s741_s6 = inlined_call_operand.vmem [shape: f32[16,1], index: 6, kind: input, shape index: {}]   ;;  %s742_s3 = inlined_call_operand.vmem [shape: f32[32,64], index: 3, kind: input, shape index: {}]   ;;  %s743_s0 = inlined_call_operand.vmem [shape: f32[1,128], index: 0, kind: input, shape index: {}]   ;;  %s744_s5 = inlined_call_operand.vmem [shape: f32[16,32], index: 5, kind: input, shape index: {}]   ;;  %s745_s7 = inlined_call_operand.vmem [shape: f32[1,16], index: 7, kind: input, shape index: {}]   ;;  %s746_s9 = inlined_call_operand.vmem [shape: f32[1,128], index: 9, kind: output, shape index: {}]  }
   0x1   :  { %580 = vset.pattern.permute.xlu1 %v581_v0  ;;  %579 = vset.pattern.permute.xlu0 %v581_v0  ;;  %v97_v1 = vld [vmem:[%s737_s2] sm:$0xff]  ;;  %v14_v3 = vstv %s739_s8  ;;  %v98_v4 = vld [vmem:[%s737_s2 + $0x8] sm:$0xff]  ;;  %v38_v6 = vld [vmem:[%s738_s1 + $0x18] sm:$0xff]  ;;  %vm400_vm3 = vcmask 130048  }
   0x2   :  { %v35_v2 = vld [vmem:[%s738_s1] sm:$0xff]  ;;  %107 = vperm.xlu1 %580, %v97_v1   ;;  %15 = vst [vmem:[#allocation2] sm:$0x1] %v14_v3  ;;  %v36_v5 = vld [vmem:[%s738_s1 + $0x8] sm:$0xff]  ;;  %v37_v7 = vld [vmem:[%s738_s1 + $0x10] sm:$0xff] }
   0x3   :  { %45 = vperm.xlu0 %579, %v35_v2   ;;  %v100_v8 = vld [vmem:[%s737_s2 + $0x18] sm:$0xff]  ;;  %v99_v9 = vld [vmem:[%s737_s2 + $0x10] sm:$0xff]  ;;  %v40_v10 = vld [vmem:[%s738_s1 + $0x28] sm:$0xff] }
   0x4   :  { %v39_v11 = vld [vmem:[%s738_s1 + $0x20] sm:$0xff]  ;;  %v102_v12 = vld [vmem:[%s737_s2 + $0x28] sm:$0xff]  ;;  %v42_v14 = vld [vmem:[%s738_s1 + $0x38] sm:$0xff] }
   0x5   :  { %v101_v13 = vld [vmem:[%s737_s2 + $0x20] sm:$0xff]  ;;  %v41_v15 = vld [vmem:[%s738_s1 + $0x30] sm:$0xff]  ;;  %v104_v16 = vld [vmem:[%s737_s2 + $0x38] sm:$0xff] }
   0x6   :  { %112 = vperm.xlu1 %580, %v98_v4   ;;  %v103_v17 = vld [vmem:[%s737_s2 + $0x30] sm:$0xff]  ;;  %v166_v18 = vld [vmem:[%s740_s4 + $0x8] sm:$0xff]  ;;  %v165_v19 = vld [vmem:[%s740_s4] sm:$0xff] }
   0x7   :  { %50 = vperm.xlu0 %579, %v36_v5   ;;  %v168_v20 = vld [vmem:[%s740_s4 + $0x18] sm:$0xff]  ;;  %v167_v21 = vld [vmem:[%s740_s4 + $0x10] sm:$0xff]  ;;  %v161_v22 = vld [vmem:[%s742_s3] sm:$0xff] }
   0x8   :  { %v294_v23 = vld [vmem:[%s741_s6 + $0x8] sm:$0xff]  ;;  %v293_v24 = vld [vmem:[%s741_s6] sm:$0xff]  ;;  %524 = vmatprep.mubr.msk.f32.mxu0 %vm189_vm0, %v161_v22 }
   0x9   :  { %v390_v25 = vld [vmem:[#allocation2] sm:$0x1] }
   0xa   :  { %60 = vperm.xlu1 %580, %v38_v6   ;;  %v479_v26 = vld [vmem:[%s743_s0] ss:$0 sm:$0xff] }
   0xb   :  { %55 = vperm.xlu0 %579, %v37_v7   ;;  %v162_v7 = vld [vmem:[%s742_s3 + $0x8] sm:$0xff] }
   0xe   :  { %122 = vperm.xlu1 %580, %v100_v8   ;;  %v163_v8 = vld [vmem:[%s742_s3 + $0x10] sm:$0xff] }
   0xf   :  { %117 = vperm.xlu0 %579, %v99_v9   ;;  %v164_v9 = vld [vmem:[%s742_s3 + $0x18] sm:$0xff] }
  0x12   :  { %70 = vperm.xlu1 %580, %v40_v10   ;;  %v291_v10 = vld [vmem:[%s744_s5] sm:$0xff] }
  0x13   :  { %65 = vperm.xlu0 %579, %v39_v11   ;;  %538 = vmatprep.mubr.msk.f32.mxu1 %vm305_vm1, %v291_v10 }
  0x16   :  { %132 = vperm.xlu1 %580, %v102_v12  }
  0x17   :  { %127 = vperm.xlu0 %579, %v101_v13  }
  0x1a   :  { %80 = vperm.xlu1 %580, %v42_v14  }
  0x1b   :  { %75 = vperm.xlu0 %579, %v41_v15  }
  0x1e   :  { %142 = vperm.xlu1 %580, %v104_v16  }
  0x1f   :  { %137 = vperm.xlu0 %579, %v103_v17  }
  0x22   :  { %176 = vperm.xlu1 %580, %v166_v18  }
  0x23   :  { %171 = vperm.xlu0 %579, %v165_v19  }
  0x26   :  { %186 = vperm.xlu1 %580, %v168_v20  }
  0x27   :  { %181 = vperm.xlu0 %579, %v167_v21  }
  0x2a   :  { %302 = vperm.xlu1 %580, %v294_v23  }
  0x2b   :  { %297 = vperm.xlu0 %579, %v293_v24  }
  0x2f   :  { %393 = vperm.xlu0 %579, %v390_v25  }
  0x81   :  { %v108_v27 = vpop.permute.xlu1 %107 }
  0x82   :  { %v46_v28 = vpop.permute.xlu0 %45 }
  0x83   :  { %v89_v29 = vmul.f32 %v479_v26, %v46_v28 }
  0x85   :  { %v113_v30 = vpop.permute.xlu1 %112  ;;  %v145_v32 = vadd.f32 %v108_v27, %v89_v29  ;;  %v292_v29 = vld [vmem:[%s744_s5 + $0x8] sm:$0xff] }
  0x86   :  { %v51_v31 = vpop.permute.xlu0 %50 }
  0x87   :  { %v90_v33 = vmul.f32 %v479_v26, %v51_v31  ;;  %v153_v37 = vmax.f32 %v145_v32, 0.0  ;;  %v584_v31 = vmov 0.0  }
  0x89   :  { %v146_v34 = vadd.f32 %v113_v30, %v90_v33  ;;  %v61_v35 = vpop.permute.xlu1 %60  ;;  %v582_v30 = vmov 0.0|0.0  }
  0x8a   :  { %v56_v36 = vpop.permute.xlu0 %55  ;;  %v92_v39 = vmul.f32 %v479_v26, %v61_v35 }
  0x8b   :  { %v154_v38 = vmax.f32 %v146_v34, 0.0  ;;  %v91_v40 = vmul.f32 %v479_v26, %v56_v36 }
  0x8d   :  { %v548_v41 = vpack.c.bf16 %v154_v38, %v153_v37  ;;  %v123_v42 = vpop.permute.xlu1 %122 }
  0x8e   :  { %v118_v43 = vpop.permute.xlu0 %117  ;;  %v148_v44 = vadd.f32 %v123_v42, %v92_v39  ;;  %v396_v42 = vlaneseq }
  0x8f   :  { %v147_v45 = vadd.f32 %v118_v43, %v91_v40  ;;  %549 = vmatprep.subr.bf16.mxu0 %v548_v41 }
  0x90   :  { %551 = vmatpush3.bf16.msra.mxu0 %v548_v41  ;;  %v156_v46 = vmax.f32 %v148_v44, 0.0  ;;  %v389_v41 = vld [vmem:[%s745_s7] sm:$0x1]  ;;  %v397_v43 = vshrl.u32 %v396_v42, 7 }
  0x91   :  { %v155_v47 = vmax.f32 %v147_v45, 0.0  ;;  %v71_v48 = vpop.permute.xlu1 %70 }
  0x92   :  { %v66_v49 = vpop.permute.xlu0 %65  ;;  %v94_v51 = vmul.f32 %v479_v26, %v71_v48  ;;  %v398_v44 = vsub.s32 0, %v397_v43 }
  0x93   :  { %v552_v50 = vpack.c.bf16 %v156_v46, %v155_v47  ;;  %v93_v52 = vmul.f32 %v479_v26, %v66_v49 }
  0x95   :  { %553 = vmatprep.subr.bf16.mxu0 %v552_v50  ;;  %v133_v53 = vpop.permute.xlu1 %132 }
  0x96   :  { %v128_v54 = vpop.permute.xlu0 %127  ;;  %555 = vmatpush3.bf16.msra.mxu0 %v552_v50  ;;  %v150_v55 = vadd.f32 %v133_v53, %v94_v51 }
  0x97   :  { %v149_v56 = vadd.f32 %v128_v54, %v93_v52 }
  0x98   :  { %v158_v57 = vmax.f32 %v150_v55, 0.0 }
  0x99   :  { %v157_v58 = vmax.f32 %v149_v56, 0.0  ;;  %v81_v59 = vpop.permute.xlu1 %80 }
  0x9a   :  { %v76_v60 = vpop.permute.xlu0 %75  ;;  %v96_v62 = vmul.f32 %v479_v26, %v81_v59 }
  0x9b   :  { %v556_v61 = vpack.c.bf16 %v158_v57, %v157_v58  ;;  %v95_v63 = vmul.f32 %v479_v26, %v76_v60 }
  0x9d   :  { %557 = vmatprep.subr.bf16.mxu0 %v556_v61  ;;  %v143_v0 = vpop.permute.xlu1 %142 }
  0x9e   :  { %v138_v1 = vpop.permute.xlu0 %137  ;;  %559 = vmatpush3.bf16.msra.mxu0 %v556_v61  ;;  %v152_v2 = vadd.f32 %v143_v0, %v96_v62 }
  0x9f   :  { %v151_v3 = vadd.f32 %v138_v1, %v95_v63 }
  0xa0   :  { %v160_v4 = vmax.f32 %v152_v2, 0.0 }
  0xa1   :  { %v159_v5 = vmax.f32 %v151_v3, 0.0  ;;  %v177_v11 = vpop.permute.xlu1 %176 }
  0xa2   :  { %v172_v12 = vpop.permute.xlu0 %171 }
  0xa3   :  { %v560_v6 = vpack.c.bf16 %v160_v4, %v159_v5 }
  0xa5   :  { %561 = vmatprep.subr.bf16.mxu0 %v560_v6  ;;  %v187_v18 = vpop.permute.xlu1 %186 }
  0xa6   :  { %563 = vmatpush3.bf16.msra.mxu0 %v560_v6  ;;  %v182_v21 = vpop.permute.xlu0 %181 }
  0xa9   :  { %525 = vmatmul.mubr.msk.f32.vlgmr.msra.gmra.mrb[0].mxu0 %vm189_vm0, %v162_v7  ;;  %v303_v32 = vpop.permute.xlu1 %302 }
  0xaa   :  { %527 = vmatprep.mubr.msk.f32.mxu0 %vm189_vm0, %v163_v8  ;;  %v298_v34 = vpop.permute.xlu0 %297 }
  0xad   :  { %528 = vmatmul.mubr.msk.f32.gmra.mrb[2].mxu0 %vm189_vm0, %v164_v9 }
  0xae   :  { %v394_v45 = vpop.permute.xlu0 %393 }
  0xaf   :  { %v399_v46 = vrot.slane %v394_v45, %v398_v44 }
 0x17c   :  { %v526_v13 = vpop.f32.mrb[0].mxu0 }
 0x17d   :  { %v274_v14 = vadd.f32 %v526_v13, %v177_v11  ;;  %v268_v15 = vpop.f32.mrb[1].mxu0 }
 0x17e   :  { %v269_v16 = vadd.f32 %v268_v15, %v172_v12 }
 0x17f   :  { %v288_v17 = vmax.f32 %v274_v14, 0.0 }
 0x180   :  { %v287_v19 = vmax.f32 %v269_v16, 0.0  ;;  %v529_v20 = vpop.f32.mrb[2].mxu0 }
 0x181   :  { %v284_v22 = vadd.f32 %v529_v20, %v187_v18  ;;  %v278_v23 = vpop.f32.mrb[3].mxu0 }
 0x182   :  { %v279_v24 = vadd.f32 %v278_v23, %v182_v21  ;;  %v564_v25 = vpack.c.bf16 %v288_v17, %v287_v19 }
 0x183   :  { %v290_v26 = vmax.f32 %v284_v22, 0.0 }
 0x184   :  { %v289_v27 = vmax.f32 %v279_v24, 0.0  ;;  %565 = vmatprep.subr.bf16.mxu1 %v564_v25 }
 0x185   :  { %567 = vmatpush3.bf16.msra.mxu1 %v564_v25 }
 0x186   :  { %v568_v28 = vpack.c.bf16 %v290_v26, %v289_v27 }
 0x188   :  { %569 = vmatprep.subr.bf16.mxu1 %v568_v28 }
 0x189   :  { %571 = vmatpush3.bf16.msra.mxu1 %v568_v28 }
 0x18a   :  { %572 = vmatprep.subr.bf16.mxu1 %v582_v30 }
 0x18c   :  { %539 = vmatmul.mubr.msk.f32.vlgmr.msra.gmra.mrb[0].mxu1 %vm305_vm1, %v292_v29 }
 0x18d   :  { %545 = vmatprep.mubr.msk.f32.mxu1 %vm583_vm2, %v584_v31 }
 0x25f   :  { %v540_v33 = vpop.f32.mrb[0].mxu1 }
 0x260   :  { %v384_v35 = vadd.f32 %v540_v33, %v303_v32  ;;  %v378_v36 = vpop.f32.mrb[1].mxu1 }
 0x261   :  { %v379_v37 = vadd.f32 %v378_v36, %v298_v34 }
 0x262   :  { %v388_v38 = vmax.f32 %v384_v35, 0.0 }
 0x263   :  { %v387_v39 = vmax.f32 %v379_v37, 0.0 }
 0x265   :  { %v573_v40 = vpack.c.bf16 %v388_v38, %v387_v39 }
 0x267   :  { %574 = vmatpush3.bf16.msra.mxu1 %v573_v40 }
 0x26a   :  { %546 = vmatmul.mubr.msk.f32.vlgmr.msra.gmra.mrb[2].mxu1 %vm400_vm3, %v389_v41 }
 0x33d   :  { %v470_v47 = vpop.f32.mrb[2].mxu1 }
 0x33e   :  { %v471_v48 = vadd.f32 %v470_v47, %v399_v46  ;;  %v547_v49 = vpop.f32.mrb[3].mxu1 }
 0x340   :  { %474 = vst [vmem:[%s746_s9] sm:$0x1] %v471_v48 }

</bundles_post_ra>
